<compile_context>
chip_gen: v7x
topology: tpu7x:2x2x1
jax: 0.10.0
libtpu: 0.0.40
codegen_flags: <defaults>
</compile_context>

<pallas_src>
import jax
import jax.numpy as jnp
from jax import lax
from jax.experimental import pallas as pl
from jax.experimental.pallas import tpu as pltpu


def _dense_bias_kernel(x_ref, w_ref, b_ref, o_ref):
    """o = x @ W^T + b for one M tile.

    x_ref: (tile_m, H)  activation tile (compute dtype)
    w_ref: (H, H)       weight in PyTorch (out, in) order, grid-resident
    b_ref: (1, H)       bias (f32)
    o_ref: (tile_m, H)  output tile (original activation dtype)
    """
    acc = lax.dot_general(
        x_ref[...],
        w_ref[...],
        # Contract x's H_in with W's "in" axis (axis 1) -> (tile_m, H_out);
        # equivalent to x @ W.T without materializing a transposed weight.
        dimension_numbers=(((1,), (1,)), ((), ())),
        preferred_element_type=jnp.float32,
    )
    o_ref[...] = (acc + b_ref[...]).astype(o_ref.dtype)
    # TODO(synk): dropout with p > 0 would need pltpu.prng_seed /
    # pltpu.prng_random_bits in-kernel; hidden_dropout_prob = 0.0 => identity.


def _select_tile_m(M, H, x_itemsize, out_itemsize,
                   tile_vmem_budget_bytes=12 * 1024 * 1024):
    """Pick an MXU-aligned M tile that keeps pipelined x/out buffers in budget.

    Only the tile-dependent buffers (x and out, double-buffered by the Pallas
    pipeline) count against the budget; the (H, H) weight + bias are resident
    across the grid. The budget is sized so ViT-B/L/H configs stay under the
    smallest default scoped-VMEM limit across v5e/v6e/v7x.
    """
    if M <= 256:
        # Small problem: one full-extent block (always layout-legal, even when
        # M is not a multiple of 8, e.g. M = batch * 197 for real ViT).
        return M
    tile = 1024 if x_itemsize <= 2 else 512          # bf16 inputs -> taller tiles
    per_row_bytes = 2 * H * (x_itemsize + out_itemsize)   # double-buffered in+out
    while tile > 128 and tile * per_row_bytes > tile_vmem_budget_bytes:
        tile //= 2
    while tile > M:                                   # never emit a block taller than M
        tile //= 2
    return max(tile, 128)


def vit_self_output(hidden_state, weight, bias, *, tile_m=None,
                    compute_dtype=jnp.bfloat16):
    """Pallas forward for ViTSelfOutput.

    hidden_state: (B, S, H); weight: (H, H) in PyTorch (out, in) order;
    bias: (H,). Returns (B, S, H) in hidden_state.dtype.
    """
    B, S, H = hidden_state.shape
    assert weight.shape == (H, H) and bias.shape == (H,)
    M = B * S
    out_dtype = hidden_state.dtype

    # bf16 inputs halve HBM/DMA bytes; accumulation stays f32 inside the kernel.
    x2d = hidden_state.reshape(M, H).astype(compute_dtype)
    w = weight.astype(compute_dtype)       # no transpose: kernel contracts on axis 1
    b2d = bias.reshape(1, H).astype(jnp.float32)

    if tile_m is None:
        tile_m = _select_tile_m(M, H, x2d.dtype.itemsize,
                                jnp.dtype(out_dtype).itemsize)
    tile_m = min(tile_m, M)
    grid_m = pl.cdiv(M, tile_m)            # partial last block is masked by Pallas

    out2d = pl.pallas_call(
        _dense_bias_kernel,
        out_shape=jax.ShapeDtypeStruct((M, H), out_dtype),
        grid_spec=pltpu.PrefetchScalarGridSpec(
            num_scalar_prefetch=0,
            grid=(grid_m,),
            in_specs=[
                # Activation tile: pipelined / double-buffered along the M grid.
                pl.BlockSpec((tile_m, H), lambda i: (i, 0)),
                # Weight / bias index maps are constant -> fetched once and
                # re-used across the grid (no re-DMA). pl.Buffered(1) could
                # halve their VMEM further; default kept for portability since
                # bf16 already halves the resident weight footprint.
                pl.BlockSpec((H, H), lambda i: (0, 0)),
                pl.BlockSpec((1, H), lambda i: (0, 0)),
            ],
            out_specs=pl.BlockSpec((tile_m, H), lambda i: (i, 0)),
        ),
        compiler_params=pltpu.CompilerParams(
            # Independent M tiles: megacore-shards across both TCs on v7x.
            dimension_semantics=("parallel",),
        ),
    )(x2d, w, b2d)

    return out2d.reshape(B, S, H)


if __name__ == "__main__":
    # Small synthetic config consistent with the module: batch=2, seq=8, hidden=32.
    B, S, H = 2, 8, 32
    key = jax.random.PRNGKey(0)
    kx, kw, kb = jax.random.split(key, 3)

    hidden_state = jax.random.normal(kx, (B, S, H), dtype=jnp.float32)
    weight = jax.random.normal(kw, (H, H), dtype=jnp.float32) * 0.02   # (out, in)
    bias = jax.random.normal(kb, (H,), dtype=jnp.float32) * 0.02

    # Reference = PyTorch Linear + Dropout(p=0) semantics.
    ref = hidden_state @ weight.T + bias

    # 1) Default path: auto tile, bf16 compute / f32 accumulate.
    out = jax.block_until_ready(vit_self_output(hidden_state, weight, bias))
    assert out.shape == (B, S, H)
    assert jnp.allclose(out, ref, atol=1e-2, rtol=1e-2)

    # 2) Multi-step pipelined grid (tile_m < M), f32 compute, tight tolerance.
    out_tiled = jax.block_until_ready(
        vit_self_output(hidden_state, weight, bias, tile_m=8,
                        compute_dtype=jnp.float32))
    assert jnp.allclose(out_tiled, ref, atol=1e-4, rtol=1e-4)

    # 3) Uneven M (S=9 -> M=18 not divisible by tile_m=8): masked edge block.
    hs2 = jax.random.normal(kx, (2, 9, H), dtype=jnp.float32)
    ref2 = hs2 @ weight.T + bias
    out2 = jax.block_until_ready(
        vit_self_output(hs2, weight, bias, tile_m=8, compute_dtype=jnp.float32))
    assert jnp.allclose(out2, ref2, atol=1e-4, rtol=1e-4)

    print("KERNEL_OK")
</pallas_src>

<mosaic_0001>
module attributes {stable_mosaic.version = 11 : i64} {
  func.func @_dense_bias_kernel(%arg0: i32, %arg1: memref<16x32xbf16, #tpu.memory_space<vmem>>, %arg2: memref<32x32xbf16, #tpu.memory_space<vmem>>, %arg3: memref<1x32xf32, #tpu.memory_space<vmem>>, %arg4: memref<16x32xf32, #tpu.memory_space<vmem>>) attributes {dimension_semantics = [#tpu.dimension_semantics<parallel>], iteration_bounds = array<i64: 1>, scalar_prefetch = 0 : i64, scratch_operands = 0 : i64, tpu.core_type = #tpu.core_type<tc>, window_params = [{transform_indices = @transform_0, window_bounds = array<i64: 16, 32>}, {pipeline_mode = #tpu.pipeline_mode<synchronous>, transform_indices = @transform_1, window_bounds = array<i64: 32, 32>}, {pipeline_mode = #tpu.pipeline_mode<synchronous>, transform_indices = @transform_2, window_bounds = array<i64: 1, 32>}, {transform_indices = @transform_3, window_bounds = array<i64: 16, 32>}]} {
    %c0 = arith.constant 0 : index
    %c0_0 = arith.constant 0 : index
    %0 = vector.load %arg1[%c0, %c0_0] : memref<16x32xbf16, #tpu.memory_space<vmem>>, vector<16x32xbf16>
    %c0_1 = arith.constant 0 : index
    %c0_2 = arith.constant 0 : index
    %1 = vector.load %arg2[%c0_1, %c0_2] : memref<32x32xbf16, #tpu.memory_space<vmem>>, vector<32x32xbf16>
    %cst = arith.constant dense<0.000000e+00> : vector<16x32xf32>
    %2 = tpu.matmul %0, %1, %cst {dimension_numbers = #tpu.dot_dimension_numbers<[1], [1], [0], [0], [0, 0, 1, 0], [], []>} : vector<16x32xbf16>, vector<32x32xbf16>, vector<16x32xf32> -> vector<16x32xf32>
    %c0_3 = arith.constant 0 : index
    %c0_4 = arith.constant 0 : index
    %3 = vector.load %arg3[%c0_3, %c0_4] : memref<1x32xf32, #tpu.memory_space<vmem>>, vector<1x32xf32>
    %4 = vector.broadcast %3 : vector<1x32xf32> to vector<16x32xf32>
    %5 = arith.addf %2, %4 : vector<16x32xf32>
    %c0_5 = arith.constant 0 : index
    %c0_6 = arith.constant 0 : index
    %6 = vector.load %arg4[%c0_5, %c0_6] : memref<16x32xf32, #tpu.memory_space<vmem>>, vector<16x32xf32>
    tpu.vector_store %arg4[%c0_5, %c0_6], %5 {strides = array<i32>} : memref<16x32xf32, #tpu.memory_space<vmem>>, vector<16x32xf32>,
    return
  }
  func.func @transform_0(%arg0: i32) -> (i32, i32) {
    %c0_i32 = arith.constant 0 : i32
    %c0_i32_0 = arith.constant 0 : i32
    return %arg0, %c0_i32 : i32, i32
  }
  func.func @transform_1(%arg0: i32) -> (i32, i32) {
    %c0_i32 = arith.constant 0 : i32
    %c0_i32_0 = arith.constant 0 : i32
    %c0_i32_1 = arith.constant 0 : i32
    return %c0_i32, %c0_i32_0 : i32, i32
  }
  func.func @transform_2(%arg0: i32) -> (i32, i32) {
    %c0_i32 = arith.constant 0 : i32
    %c0_i32_0 = arith.constant 0 : i32
    %c0_i32_1 = arith.constant 0 : i32
    return %c0_i32, %c0_i32_0 : i32, i32
  }
  func.func @transform_3(%arg0: i32) -> (i32, i32) {
    %c0_i32 = arith.constant 0 : i32
    %c0_i32_0 = arith.constant 0 : i32
    return %arg0, %c0_i32 : i32, i32
  }
}

</mosaic_0001>

<bundles_post_ra>
// kernel: tpu_custom_call.1
= control target key start
LH: loop header
LB: loop body
LE: loop exit
PB: predicated region body
PF: predicated region fallthrough
CT: control target
= control target key end

     0   :  { %8 = vsyncpa [#allocation3], 0  ;;  %s316_s0 = inlined_call_operand.hbm [shape: bf16[16,32], index: 0, kind: input, shape index: {}]   ;;  %s317_s1 = inlined_call_operand.hbm [shape: bf16[32,32], index: 1, kind: input, shape index: {}]   ;;  %s318_s2 = inlined_call_operand.vmem [shape: f32[1,32], index: 2, kind: input, shape index: {}]   ;;  %s319_s3 = inlined_call_operand.hbm [shape: f32[16,32], index: 3, kind: output, shape index: {}]  }
   0x1   :  { %9 = vsyncpa [#allocation6], 0 }
   0x2   :  { %10 = vsyncpa [#allocation4], 0  ;;  %s243_s12 = smov [#allocation2]   ;;  %s171_s16 = scalar_lea.hbm %s316_s0, 128 }
   0x3   :  { %s16_s13 = sshll.u32 %s243_s12, 4  ;;  %p172_p0 = scmp.ne.s32.totalorder %s316_s0, %s171_s16  ;;  %s17_s13 = int_to_ptr.vmem [resolvable:$true] %s16_s13 }
   0x4   :  { %p175_p1 = scmp.lt.u32.totalorder %s171_s16, %s316_s0 }
   0x6   :  { %p177_p2 = pnand %p175_p1, %p172_p0 }
   0x8   :  { %180 = shalt.err (!%p177_p2)
}
   0x9   :  { %s181_s21 = scalar_lea.vmem %s17_s13, 128  ;;  %p186_p4 = scmp.lt.s32.totalorder %s17_s13, %s17_s13 }
   0xa   :  { %p182_p3 = scmp.ne.s32.totalorder %s17_s13, %s181_s21  ;;  %p187_p5 = scmp.lt.s32.totalorder %s181_s21, %s181_s21 }
   0xc   :  { %p188_p6 = por %p187_p5, %p186_p4 }
   0xe   :  { %p189_p7 = pnand %p188_p6, %p182_p3 }
  0x10   :  { %192 = shalt.err (!%p189_p7)
}
  0x11   :  { %s244_s22 = smov 64   ;;  %s245_s23 = smov 4  }
  0x12   :  { %22 = dma.hbm_to_vmem [thread:$0]  %s316_s0, 128, %s17_s13, [#allocation3], %s244_s22, %s244_s22, %s245_s23  }
  0x13   :  { %s246_s26 = smov [#allocation5]   ;;  %s193_s30 = scalar_lea.hbm %s317_s1, 256 }
  0x14   :  { %s28_s27 = sshll.u32 %s246_s26, 4  ;;  %p194_p8 = scmp.ne.s32.totalorder %s317_s1, %s193_s30  ;;  %s29_s27 = int_to_ptr.vmem [resolvable:$true] %s28_s27 }
  0x15   :  { %p197_p9 = scmp.lt.u32.totalorder %s193_s30, %s317_s1 }
  0x17   :  { %p199_p10 = pnand %p197_p9, %p194_p8 }
  0x19   :  { %202 = shalt.err (!%p199_p10)
}
  0x1a   :  { %s203_s8 = scalar_lea.vmem %s29_s27, 256  ;;  %p208_p12 = scmp.lt.s32.totalorder %s29_s27, %s29_s27 }
  0x1b   :  { %p204_p11 = scmp.ne.s32.totalorder %s29_s27, %s203_s8  ;;  %p209_p13 = scmp.lt.s32.totalorder %s203_s8, %s203_s8 }
  0x1d   :  { %p210_p0 = por %p209_p13, %p208_p12 }
  0x1f   :  { %p211_p1 = pnand %p210_p0, %p204_p11 }
  0x21   :  { %214 = shalt.err (!%p211_p1)
}
  0x22   :  { %34 = dma.hbm_to_vmem [thread:$0]  %s317_s1, 256, %s29_s27, [#allocation6], %s244_s22, %s244_s22, %s245_s23  }
  0x23   :  { %237 = dma.done.wait [#allocation3], 128  }
  0x24   :  { %238 = vsyncadd [#allocation3], 4294967168 }
  0x25   :  { %239 = dma.done.wait [#allocation6], 256  }
  0x26   :  { %240 = vsyncadd [#allocation6], 4294967040  ;;  %v247_v0 = vmov 0.0   ;;  %vm248_vm0 = vmmov 0   ;;  %vm72_vm1 = vcmask 261120   ;;  %v168_v1 = vld [vmem:[#allocation5] sm:$0xff]  }
  0x27   :  { %151 = vmatprep.subr.bf16.mxu0 %v247_v0  ;;  %155 = vmatprep.mubr.msk.bf16.mxu0 %vm248_vm0, %v247_v0  ;;  %v77_v2 = vsel %vm72_vm1, %v168_v1, 0  ;;  %v169_v3 = vld [vmem:[#allocation5 + $0x8] sm:$0xff]   ;;  %v170_v5 = vld [vmem:[#allocation2] sm:$0xff]   ;;  %s249_s11 = smov [#allocation7]  }
  0x28   :  { %152 = vmatpush3.bf16.xpose.msra.mxu0 %v77_v2  ;;  %v80_v4 = vsel %vm72_vm1, %v169_v3, 0  ;;  %v143_v6 = vld [vmem:[%s318_s2] ss:$0 sm:$0xff]  ;;  %s130_s12 = sshll.u32 %s249_s11, 4  ;;  %s131_s12 = int_to_ptr.vmem [resolvable:$true] %s130_s12 }
  0x29   :  { %153 = vmatprep.subr.bf16.mxu0 %v247_v0  ;;  %s215_s13 = scalar_lea.vmem %s131_s12, 256  ;;  %p220_p3 = scmp.lt.s32.totalorder %s131_s12, %s131_s12 }
  0x2a   :  { %p216_p2 = scmp.ne.s32.totalorder %s131_s12, %s215_s13  ;;  %p221_p4 = scmp.lt.s32.totalorder %s215_s13, %s215_s13 }
  0x2c   :  { %p222_p5 = por %p221_p4, %p220_p3 }
  0x2e   :  { %p223_p6 = pnand %p222_p5, %p216_p2 }
  0x30   :  { %154 = vmatpush3.bf16.xpose.msra.mxu0 %v80_v4 }
  0x37   :  { %156 = vmatmul.mubr.msk.bf16.vlgmr.msra.gmra.mrb[0].mxu0 %vm72_vm1, %v170_v5 }
 0x10a   :  { %v116_v7 = vpop.f32.mrb[0].mxu0 }
 0x10b   :  { %v117_v8 = vadd.f32 %v143_v6, %v116_v7  ;;  %v157_v9 = vpop.f32.mrb[1].mxu0 }
 0x10c   :  { %v119_v10 = vpop.f32.mrb[2].mxu0 }
 0x10d   :  { %123 = vst.msk [vmem:[#allocation7] sm:$0xff] %vm72_vm1, %v117_v8  ;;  %v120_v11 = vadd.f32 %v143_v6, %v119_v10  ;;  %v158_v12 = vpop.f32.mrb[3].mxu0 }
 0x10f   :  { %124 = vst.msk [vmem:[#allocation7 + $0x8] sm:$0xff] %vm72_vm1, %v120_v11 }
 0x110   :  { %226 = shalt.err (!%p223_p6)
}
 0x111   :  { %s227_s15 = scalar_lea.hbm %s319_s3, 256 }
 0x112   :  { %p228_p7 = scmp.ne.s32.totalorder %s319_s3, %s227_s15  ;;  %p231_p8 = scmp.lt.u32.totalorder %s227_s15, %s319_s3 }
 0x114   :  { %p233_p9 = pnand %p231_p8, %p228_p7 }
 0x116   :  { %236 = shalt.err (!%p233_p9)
}
 0x117   :  { %s250_s20 = smov 128   ;;  %s251_s21 = smov 8  }
 0x118   :  { %136 = dma.vmem_to_hbm [thread:$0]  %s131_s12, 256, %s319_s3, [#allocation4], %s250_s20, %s250_s20, %s251_s21  }
 0x119   :  { %241 = dma.done.wait [#allocation4], 256  }
 0x11a   :  { %242 = vsyncadd [#allocation4], 4294967040 }
 0x11b   :  { %140 = vsyncpa [#allocation3], 1 }
 0x11c   :  { %141 = vsyncpa [#allocation6], 1 }
 0x11d   :  { %142 = vsyncpa [#allocation4], 1 }

</bundles_post_ra>
